<compile_context>
chip_gen: v7x
topology: tpu7x:2x2x1
jax: 0.10.0
libtpu: 0.0.40
codegen_flags: <defaults>
</compile_context>

<pallas_src>
import functools

import jax
import jax.numpy as jnp
from jax.experimental import pallas as pl
from jax.experimental.pallas import tpu as pltpu


def _round_up(x, m):
    return (x + m - 1) // m * m


def _vmem_capacity_bytes():
    try:
        return int(pltpu.get_tpu_info().vmem_capacity_bytes)
    except Exception:
        return 64 * 1024 * 1024  # conservative (v7x-sized) fallback


def _label_smoothing_kernel(pred_ref, tgt_ref, out_ref, acc_ref, *,
                            smooth_val, confidence, total_n, row_tile,
                            tiles_per_split, mask_first_tile, total_tiles):
    i = pl.program_id(1)

    @pl.when(i == 0)
    def _():
        acc_ref[...] = jnp.zeros_like(acc_ref)

    x = pred_ref[...]                                       # (R, C)
    if x.dtype != jnp.float32:                              # skip astype for f32
        x = x.astype(jnp.float32)

    # Stable log-softmax pieces; never materialize logp over the tile.
    m = jnp.max(x, axis=1, keepdims=True)                   # (R, 1)
    lse = jnp.log(jnp.sum(jnp.exp(x - m), axis=1, keepdims=True))

    # true_dist weights: smooth_val off-target, confidence at the target.
    tgt = tgt_ref[...]                                      # (R, 1) int32
    col = jax.lax.broadcasted_iota(jnp.int32, x.shape, 1)
    w = jnp.where(col == tgt, confidence, smooth_val)       # (R, C)
    s = jnp.sum(w * x, axis=1, keepdims=True)               # (R, 1)

    # sum_c(-true_dist * logp) = (m + lse) * sum_c(true_dist) - sum_c(true_dist * x)
    # and sum_c(true_dist) == 1.
    row_loss = (m + lse) - s                                # (R, 1)

    tile_idx = pl.program_id(0) * tiles_per_split + i       # logical tile index

    if total_tiles <= mask_first_tile:
        # Every tile is fully inside the batch: no masking anywhere.
        acc_ref[...] = acc_ref[...] + row_loss
    else:
        @pl.when(tile_idx < mask_first_tile)
        def _():
            acc_ref[...] = acc_ref[...] + row_loss

        @pl.when(tile_idx >= mask_first_tile)
        def _():
            # Boundary / overflow tile: rows past the true batch contribute 0.
            # (select, NOT multiply-by-mask: padded rows may hold garbage.)
            row_idx = tile_idx * row_tile + jax.lax.broadcasted_iota(
                jnp.int32, (row_tile, 1), 0)
            acc_ref[...] = acc_ref[...] + jnp.where(
                row_idx < total_n, row_loss, 0.0)

    @pl.when(i == pl.num_programs(1) - 1)
    def _():
        partial_sum = jnp.sum(acc_ref[...])                 # one reduce / split
        out_ref[...] = jnp.broadcast_to(
            partial_sum, out_ref.shape).astype(jnp.float32)


def label_smoothing_loss(pred, target, *, label_smoothing, lbl_set_size,
                         row_tile=None):
    """pred: (N, C) float, target: (N,) int -> scalar float32 loss."""
    n, c = pred.shape
    assert c == lbl_set_size
    assert lbl_set_size >= 2

    confidence = 1.0 - label_smoothing
    smooth_val = label_smoothing / (lbl_set_size - 1)

    in_itemsize = jnp.dtype(pred.dtype).itemsize

    # VMEM limit scaled to the actual part: ~96 MiB on 128-MiB VMEM parts
    # (v5e/v6e), ~48 MiB on v7x (64 MiB physical).
    vmem_cap = _vmem_capacity_bytes()
    vmem_limit = int(min(vmem_cap - (16 << 20), vmem_cap * 3 // 4))
    vmem_limit = max(vmem_limit, 32 << 20)

    if row_tile is None:
        # Dtype-aware per-row footprint: double-buffered input block,
        # ~6 f32 (R,C) working arrays materialized by the body, and the
        # lane-padded (R,128) target/acc buffers + (R,1) temporaries.
        per_row = 2 * c * in_itemsize + 6 * c * 4 + 16 * 128 * 4
        budget = (vmem_limit * 2) // 3
        max_rows = max(8, budget // per_row)
        # HBM-bound: aim for >= ~2 MiB pred blocks, capped at 4096 rows.
        target_block_bytes = 2 * 1024 * 1024
        rows_for_target = max(8, target_block_bytes // (c * in_itemsize))
        row_tile = max(8, min(rows_for_target, 4096, max_rows))
    row_tile = min(row_tile, _round_up(n, 8))
    row_tile = max(8, (row_tile // 8) * 8)

    n_tiles = pl.cdiv(n, row_tile)
    num_splits = 2 if n_tiles >= 2 else 1          # both TCs on v7x megacore
    tiles_per_split = pl.cdiv(n_tiles, num_splits)
    total_tiles = num_splits * tiles_per_split     # may exceed n_tiles by 1
    mask_first_tile = n // row_tile                # first tile needing a mask

    target_2d = target.reshape(n, 1).astype(jnp.int32)

    last_block = n_tiles - 1
    if total_tiles > n_tiles:
        # Overflow tile (odd n_tiles split over 2 cores): clamp its block
        # index; its rows are fully masked in the kernel.
        def block_index(s, i):
            return jnp.minimum(s * tiles_per_split + i, last_block)
    else:
        def block_index(s, i):
            return s * tiles_per_split + i

    kernel = functools.partial(
        _label_smoothing_kernel,
        smooth_val=smooth_val,
        confidence=confidence,
        total_n=n,
        row_tile=row_tile,
        tiles_per_split=tiles_per_split,
        mask_first_tile=mask_first_tile,
        total_tiles=total_tiles,
    )

    cost = pl.CostEstimate(
        flops=6 * n * c,
        transcendentals=n * c,
        bytes_accessed=n * c * in_itemsize + n * 4 + num_splits * 128 * 4,
    )

    out = pl.pallas_call(
        kernel,
        out_shape=jax.ShapeDtypeStruct((1, num_splits * 128), jnp.float32),
        grid_spec=pltpu.PrefetchScalarGridSpec(
            num_scalar_prefetch=0,
            grid=(num_splits, tiles_per_split),
            in_specs=[
                pl.BlockSpec((row_tile, c),
                             lambda s, i: (block_index(s, i), 0)),
                pl.BlockSpec((row_tile, 1),
                             lambda s, i: (block_index(s, i), 0)),
            ],
            out_specs=pl.BlockSpec((1, 128), lambda s, i: (0, s)),
            scratch_shapes=[pltpu.VMEM((row_tile, 1), jnp.float32)],
        ),
        compiler_params=pltpu.CompilerParams(
            dimension_semantics=("parallel", "arbitrary"),
            vmem_limit_bytes=vmem_limit),
        cost_estimate=cost,
    )(pred, target_2d)

    partials = out[0, ::128]                      # one lane per split's block
    return jnp.sum(partials) / n


def _reference_loss(pred, target, *, label_smoothing, lbl_set_size):
    logp = jax.nn.log_softmax(pred.astype(jnp.float32), axis=1)
    smooth_val = label_smoothing / (lbl_set_size - 1)
    confidence = 1.0 - label_smoothing
    true_dist = jnp.full_like(logp, smooth_val)
    true_dist = true_dist.at[jnp.arange(pred.shape[0]), target].set(confidence)
    return jnp.mean(jnp.sum(-true_dist * logp, axis=1))


if __name__ == "__main__":
    key = jax.random.PRNGKey(0)
    k_pred, k_tgt = jax.random.split(key)

    N, C = 16, 32                      # batch rows, label-set size
    label_smoothing = 0.1

    pred = jax.random.normal(k_pred, (N, C), dtype=jnp.float32)
    target = jax.random.randint(k_tgt, (N,), 0, C, dtype=jnp.int32)

    loss = label_smoothing_loss(
        pred, target, label_smoothing=label_smoothing, lbl_set_size=C)
    loss = jax.block_until_ready(loss)

    ref = _reference_loss(
        pred, target, label_smoothing=label_smoothing, lbl_set_size=C)
    assert jnp.allclose(loss, ref, atol=1e-5, rtol=1e-5), (loss, ref)

    print("KERNEL_OK")
</pallas_src>

<mosaic_0001>
module attributes {stable_mosaic.version = 11 : i64} {
  func.func @_label_smoothing_kernel(%arg0: i32, %arg1: i32, %arg2: memref<16x32xf32, #tpu.memory_space<vmem>>, %arg3: memref<16x1xi32, #tpu.memory_space<vmem>>, %arg4: memref<1x128xf32, #tpu.memory_space<vmem>>, %arg5: memref<16x1xf32, #tpu.memory_space<vmem>>) attributes {dimension_semantics = [#tpu.dimension_semantics<parallel>, #tpu.dimension_semantics<arbitrary>], iteration_bounds = array<i64: 1, 1>, scalar_prefetch = 0 : i64, scratch_operands = 1 : i64, tpu.core_type = #tpu.core_type<tc>, window_params = [{transform_indices = @transform_0, window_bounds = array<i64: 16, 32>}, {transform_indices = @transform_1, window_bounds = array<i64: 16, 1>}, {transform_indices = @transform_2, window_bounds = array<i64: 1, 128>}]} {
    %c0_i32 = arith.constant 0 : i32
    %0 = arith.cmpi eq, %arg1, %c0_i32 : i32
    %1 = arith.extui %0 : i1 to i32
    %c0_i32_0 = arith.constant 0 : i32
    %2 = arith.cmpi ne, %1, %c0_i32_0 : i32
    scf.if %2 {
      %cst_14 = arith.constant 0.000000e+00 : f32
      %30 = vector.broadcast %cst_14 : f32 to vector<16x1xf32>
      %c0_15 = arith.constant 0 : index
      %c0_16 = arith.constant 0 : index
      %31 = vector.load %arg5[%c0_15, %c0_16] : memref<16x1xf32, #tpu.memory_space<vmem>>, vector<16x1xf32>
      tpu.vector_store %arg5[%c0_15, %c0_16], %30 {strides = array<i32>} : memref<16x1xf32, #tpu.memory_space<vmem>>, vector<16x1xf32>,
    } else {
    }
    %c0 = arith.constant 0 : index
    %c0_1 = arith.constant 0 : index
    %3 = vector.load %arg2[%c0, %c0_1] : memref<16x32xf32, #tpu.memory_space<vmem>>, vector<16x32xf32>
    %cst = arith.constant dense<0xFF800000> : vector<16xf32>
    %4 = vector.multi_reduction <maximumf>, %3, %cst [1] : vector<16x32xf32> to vector<16xf32>
    %5 = vector.shape_cast %4 : vector<16xf32> to vector<16x1xf32>
    %6 = vector.broadcast %5 : vector<16x1xf32> to vector<16x32xf32>
    %7 = arith.subf %3, %6 : vector<16x32xf32>
    %8 = math.exp %7 : vector<16x32xf32>
    %cst_2 = arith.constant dense<0.000000e+00> : vector<16xf32>
    %9 = vector.multi_reduction <add>, %8, %cst_2 [1] : vector<16x32xf32> to vector<16xf32>
    %10 = vector.shape_cast %9 : vector<16xf32> to vector<16x1xf32>
    %11 = math.log %10 : vector<16x1xf32>
    %c0_3 = arith.constant 0 : index
    %c0_4 = arith.constant 0 : index
    %12 = vector.load %arg3[%c0_3, %c0_4] : memref<16x1xi32, #tpu.memory_space<vmem>>, vector<16x1xi32>
    %13 = tpu.iota {dimensions = array<i32: 1>} : vector<16x32xi32>
    %14 = vector.broadcast %12 : vector<16x1xi32> to vector<16x32xi32>
    %15 = arith.cmpi eq, %13, %14 : vector<16x32xi32>
    %cst_5 = arith.constant 0.899999976 : f32
    %cst_6 = arith.constant 0.0032258064 : f32
    %16 = vector.broadcast %cst_5 : f32 to vector<16x32xf32>
    %17 = vector.broadcast %cst_6 : f32 to vector<16x32xf32>
    %18 = arith.select %15, %16, %17 : vector<16x32xi1>, vector<16x32xf32>
    %19 = arith.mulf %18, %3 : vector<16x32xf32>
    %cst_7 = arith.constant dense<0.000000e+00> : vector<16xf32>
    %20 = vector.multi_reduction <add>, %19, %cst_7 [1] : vector<16x32xf32> to vector<16xf32>
    %21 = vector.shape_cast %20 : vector<16xf32> to vector<16x1xf32>
    %22 = arith.addf %5, %11 : vector<16x1xf32>
    %23 = arith.subf %22, %21 : vector<16x1xf32>
    %c0_8 = arith.constant 0 : index
    %c0_9 = arith.constant 0 : index
    %24 = vector.load %arg5[%c0_8, %c0_9] : memref<16x1xf32, #tpu.memory_space<vmem>>, vector<16x1xf32>
    %25 = arith.addf %24, %23 : vector<16x1xf32>
    %c0_10 = arith.constant 0 : index
    %c0_11 = arith.constant 0 : index
    %26 = vector.load %arg5[%c0_10, %c0_11] : memref<16x1xf32, #tpu.memory_space<vmem>>, vector<16x1xf32>
    tpu.vector_store %arg5[%c0_10, %c0_11], %25 {strides = array<i32>} : memref<16x1xf32, #tpu.memory_space<vmem>>, vector<16x1xf32>,
    %c0_i32_12 = arith.constant 0 : i32
    %27 = arith.cmpi eq, %arg1, %c0_i32_12 : i32
    %28 = arith.extui %27 : i1 to i32
    %c0_i32_13 = arith.constant 0 : i32
    %29 = arith.cmpi ne, %28, %c0_i32_13 : i32
    scf.if %29 {
      %c0_14 = arith.constant 0 : index
      %c0_15 = arith.constant 0 : index
      %30 = vector.load %arg5[%c0_14, %c0_15] : memref<16x1xf32, #tpu.memory_space<vmem>>, vector<16x1xf32>
      %31 = vector.shape_cast %30 : vector<16x1xf32> to vector<1x16x1xf32>
      %cst_16 = arith.constant dense<0.000000e+00> : vector<1xf32>
      %32 = vector.multi_reduction <add>, %31, %cst_16 [1, 2] : vector<1x16x1xf32> to vector<1xf32>
      %33 = vector.shape_cast %32 : vector<1xf32> to vector<1x1x1xf32>
      %34 = vector.extract %33[0, 0, 0] : f32 from vector<1x1x1xf32>
      %35 = vector.broadcast %34 : f32 to vector<1x128xf32>
      %c0_17 = arith.constant 0 : index
      %c0_18 = arith.constant 0 : index
      %36 = vector.load %arg4[%c0_17, %c0_18] : memref<1x128xf32, #tpu.memory_space<vmem>>, vector<1x128xf32>
      tpu.vector_store %arg4[%c0_17, %c0_18], %35 {strides = array<i32>} : memref<1x128xf32, #tpu.memory_space<vmem>>, vector<1x128xf32>,
    } else {
    }
    return
  }
  func.func @transform_0(%arg0: i32, %arg1: i32) -> (i32, i32) {
    %c1_i32 = arith.constant 1 : i32
    %0 = arith.muli %arg0, %c1_i32 : i32
    %1 = arith.addi %0, %arg1 : i32
    %c0_i32 = arith.constant 0 : i32
    %c0_i32_0 = arith.constant 0 : i32
    return %1, %c0_i32 : i32, i32
  }
  func.func @transform_1(%arg0: i32, %arg1: i32) -> (i32, i32) {
    %c1_i32 = arith.constant 1 : i32
    %0 = arith.muli %arg0, %c1_i32 : i32
    %1 = arith.addi %0, %arg1 : i32
    %c0_i32 = arith.constant 0 : i32
    %c0_i32_0 = arith.constant 0 : i32
    return %1, %c0_i32 : i32, i32
  }
  func.func @transform_2(%arg0: i32, %arg1: i32) -> (i32, i32) {
    %c0_i32 = arith.constant 0 : i32
    %c0_i32_0 = arith.constant 0 : i32
    return %c0_i32, %arg0 : i32, i32
  }
}

</mosaic_0001>

<bundles_post_ra>
// kernel: tpu_custom_call.1
= control target key start
LH: loop header
LB: loop body
LE: loop exit
PB: predicated region body
PF: predicated region fallthrough
CT: control target
= control target key end

     0   :  { %vm65_vm0 = vcmask 261120   ;;  %v206_v4 = vmov 0   ;;  %s261_s0 = inlined_call_operand.vmem [shape: f32[16,32], index: 0, kind: input, shape index: {}]   ;;  %s262_s1 = inlined_call_operand.vmem [shape: s32[16,1], index: 1, kind: input, shape index: {}]   ;;  %s263_s2 = inlined_call_operand.hbm [shape: f32[1,128], index: 2, kind: output, shape index: {}]  }
   0x1   :  { %v63_v0 = vld [vmem:[%s261_s0] sm:$0xff]  ;;  %v64_v1 = vld [vmem:[%s261_s0 + $0x8] sm:$0xff]  ;;  %172 = vset.pattern.permute.xlu1 %v206_v4  ;;  %173 = vset.pattern.permute.xlu0 %v206_v4 }
   0x2   :  { %v88_v2 = vld [vmem:[%s262_s1] sm:$0xff]  ;;  %v66_v3 = vsel %vm65_vm0, %v63_v0, -inf }
   0x3   :  { %7 = vsyncpa [#allocation4], 0  ;;  %67 = vmax.xlane.f32.xlu0 %v66_v3  ;;  %93 = vperm.xlu1 %172, %v88_v2   ;;  %v69_v5 = vsel %vm65_vm0, %v64_v1, -inf  ;;  %v89_v6 = vld [vmem:[%s262_s1 + $0x8] sm:$0xff]  ;;  %v90_v8 = vlaneseq  ;;  %v207_v17 = vmov 0.0032258064  }
   0x4   :  { %vm60_vm3 = vcmask 7168   ;;  %v208_v28 = vmov 0.0   ;;  %s209_s0 = smov [#allocation3]  }
   0x5   :  { %v91_v13 = vand.u32 127, %v90_v8  ;;  %61 = vst.msk [vmem:[#allocation2] sm:$0xff] %vm60_vm3, %v208_v28  ;;  %62 = vst.msk [vmem:[#allocation2 + $0x8] sm:$0xff] %vm60_vm3, %v208_v28  ;;  %s146_s1 = sshll.u32 %s209_s0, 4  ;;  %s147_s1 = int_to_ptr.vmem [resolvable:$true] %s146_s1 }
   0x6   :  { %s182_s18 = scalar_lea.vmem %s147_s1, 16  ;;  %s186_s19 = scalar_lea.vmem %s147_s1, 32 }
   0x7   :  { %70 = vmax.xlane.f32.xlu0 %v69_v5  ;;  %96 = vperm.xlu1 %172, %v89_v6   ;;  %p183_p0 = scmp.ne.s32.totalorder %s147_s1, %s182_s18  ;;  %p187_p1 = scmp.lt.s32.totalorder %s147_s1, %s147_s1 }
   0x8   :  { %p188_p2 = scmp.lt.s32.totalorder %s186_s19, %s182_s18 }
   0xa   :  { %p189_p3 = por %p188_p2, %p187_p1 }
   0xc   :  { %v114_v36 = vld [vmem:[#allocation2] sm:$0xff]  ;;  %v115_v42 = vld [vmem:[#allocation2 + $0x8] sm:$0xff]  ;;  %p190_p4 = pnand %p189_p3, %p183_p0 }
  0x82   :  { %v94_v11 = vpop.permute.xlu1 %93 }
  0x83   :  { %vm98_vm1 = vcmp.eq.s32.totalorder %v91_v13, %v94_v11 }
  0x84   :  { %v100_v18 = vsel %vm98_vm1, 0.9, %v207_v17 }
  0x85   :  { %v102_v19 = vmul.f32 %v100_v18, %v63_v0 }
  0x86   :  { %v97_v16 = vpop.permute.xlu1 %96 }
  0x87   :  { %vm99_vm2 = vcmp.eq.s32.totalorder %v91_v13, %v97_v16  ;;  %v104_v23 = vsel %vm65_vm0, %v102_v19, 0.0 }
  0x88   :  { %v101_v21 = vsel %vm99_vm2, 0.9, %v207_v17 }
  0x89   :  { %v103_v24 = vmul.f32 %v101_v21, %v64_v1 }
  0x8b   :  { %v107_v27 = vsel %vm65_vm0, %v103_v24, 0.0 }
  0x90   :  { %v68_v7 = vpop.xlane.xlu0 %67 }
  0x91   :  { %v72_v9 = vsub.f32 %v63_v0, %v68_v7 }
  0x93   :  { %v74_v10 = vmul.f32 1.442695, %v72_v9 }
  0x94   :  { %v71_v12 = vpop.xlane.xlu0 %70 }
  0x95   :  { %174 = vpow2.f32 %v74_v10  ;;  %v73_v14 = vsub.f32 %v64_v1, %v71_v12 }
  0x97   :  { %v76_v15 = vmul.f32 1.442695, %v73_v14 }
  0x99   :  { %176 = vpow2.f32 %v76_v15 }
  0x9f   :  { %v175_v20 = vpop.eup %174 }
  0xa0   :  { %v78_v22 = vsel %vm65_vm0, %v175_v20, 0.0 }
  0xa1   :  { %79 = vadd.xlane.f32.xlu0 %v78_v22 }
  0xa3   :  { %v177_v25 = vpop.eup %176 }
  0xa4   :  { %v81_v26 = vsel %vm65_vm0, %v177_v25, 0.0 }
  0xa5   :  { %82 = vadd.xlane.f32.xlu1 %v81_v26  ;;  %105 = vadd.xlane.f32.xlu0 %v104_v23 }
  0xa9   :  { %108 = vadd.xlane.f32.xlu0 %v107_v27 }
 0x12e   :  { %v80_v29 = vpop.xlane.xlu0 %79 }
 0x12f   :  { %178 = vlog2.f32 %v80_v29 }
 0x132   :  { %v83_v30 = vpop.xlane.xlu1 %82  ;;  %v106_v33 = vpop.xlane.xlu0 %105 }
 0x133   :  { %180 = vlog2.f32 %v83_v30 }
 0x136   :  { %v109_v41 = vpop.xlane.xlu0 %108 }
 0x139   :  { %v179_v31 = vpop.eup %178 }
 0x13a   :  { %v85_v32 = vmul.f32 0.6931472, %v179_v31 }
 0x13c   :  { %v110_v34 = vadd.f32 %v85_v32, %v68_v7 }
 0x13d   :  { %v181_v35 = vpop.eup %180 }
 0x13e   :  { %v87_v37 = vmul.f32 0.6931472, %v181_v35  ;;  %v112_v38 = vsub.f32 %v110_v34, %v106_v33 }
 0x140   :  { %v116_v39 = vadd.f32 %v114_v36, %v112_v38  ;;  %v111_v40 = vadd.f32 %v87_v37, %v71_v12 }
 0x142   :  { %119 = vst.msk [vmem:[#allocation2] sm:$0xff] %vm60_vm3, %v116_v39  ;;  %v113_v43 = vsub.f32 %v111_v40, %v109_v41 }
 0x144   :  { %v117_v44 = vadd.f32 %v115_v42, %v113_v43 }
 0x146   :  { %120 = vst.msk [vmem:[#allocation2 + $0x8] sm:$0xff] %vm60_vm3, %v117_v44 }
 0x149   :  { %v124_v45 = vld [vmem:[#allocation2] sm:$0xff] }
 0x14a   :  { %v126_v47 = vsel %vm60_vm3, %v124_v45, 0.0 }
 0x14d   :  { %v125_v46 = vld [vmem:[#allocation2 + $0x8] sm:$0xff] }
 0x14e   :  { %v127_v48 = vsel %vm60_vm3, %v125_v46, 0.0 }
 0x14f   :  { %v128_v49 = vadd.f32 %v127_v48, %v126_v47 }
 0x151   :  { %129 = vadd.xlane.f32.xlu0 %v128_v49 }
 0x1de   :  { %v130_v50 = vpop.xlane.xlu0 %129 }
 0x1df   :  { %v131_v51 = vrot.slane %v130_v50, 4 }
 0x1e1   :  { %v132_v52 = vadd.f32 %v131_v51, %v130_v50 }
 0x1e3   :  { %v133_v53 = vrot.slane %v132_v52, 2 }
 0x1e5   :  { %v134_v54 = vadd.f32 %v133_v53, %v132_v52 }
 0x1e7   :  { %v135_v55 = vrot.slane %v134_v54, 1 }
 0x1e9   :  { %v136_v56 = vadd.f32 %v135_v55, %v134_v54 }
 0x1eb   :  { %166 = vpush %v136_v56 }
 0x21c   :  { %s167_s17 = spop %166 }
 0x21d   :  { %v138_v57 = vstv %s167_s17 }
 0x21e   :  { %139 = vst [vmem:[#allocation3] sm:$0x1] %v138_v57 }
 0x21f   :  { %193 = shalt.err (!%p190_p4)
}
 0x220   :  { %s194_s22 = scalar_lea.hbm %s263_s2, 16 }
 0x221   :  { %p195_p5 = scmp.ne.s32.totalorder %s263_s2, %s194_s22  ;;  %p198_p6 = scmp.lt.u32.totalorder %s194_s22, %s263_s2 }
 0x223   :  { %p200_p7 = pnand %p198_p6, %p195_p5 }
 0x225   :  { %203 = shalt.err (!%p200_p7)
}
 0x226   :  { %149 = dma.vmem_to_hbm [thread:$0]  %s147_s1, 16, %s263_s2, [#allocation4]  }
 0x227   :  { %204 = dma.done.wait [#allocation4], 16  }
 0x228   :  { %205 = vsyncadd [#allocation4], 4294967280 }
 0x229   :  { %153 = vsyncpa [#allocation4], 1 }

</bundles_post_ra>
